<compile_context>
chip_gen: v7x
topology: tpu7x:2x2x1
jax: 0.10.0
libtpu: 0.0.40
codegen_flags: <defaults>
</compile_context>

<pallas_src>
import functools

import jax
import jax.numpy as jnp
from jax.experimental import pallas as pl
from jax.experimental.pallas import tpu as pltpu

EPS = 1e-5


# ----------------------------------------------------------------------------
# Kernel
# ----------------------------------------------------------------------------
def _make_actor_kernel(num_hidden, batch):
    """Kernel ref signature:
       (x, bn0_gb, [W_i(bf16), gb_i] * num_hidden, W_out(bf16), b_out, out)
       where gb arrays are (2, F): row 0 = gamma, row 1 = beta.
    """
    inv_n = 1.0 / float(batch)

    def bn(z, gb, *, relu):
        # One-pass moments + folded affine:
        #   mean  = E[z]            var = max(E[z^2] - mean^2, 0)
        #   scale = gamma * rsqrt(var + eps)
        #   shift = beta - mean * scale
        #   y     = z * scale + shift        (optionally fused ReLU)
        mean = jnp.sum(z, axis=0, keepdims=True) * inv_n
        ex2 = jnp.sum(z * z, axis=0, keepdims=True) * inv_n
        var = jnp.maximum(ex2 - mean * mean, 0.0)          # clamp: f32 cancellation
        scale = gb[0:1, :] * jax.lax.rsqrt(var + EPS)       # rsqrt -> EUP (free slot)
        shift = gb[1:2, :] - mean * scale
        y = z * scale + shift
        if relu:
            y = jnp.maximum(y, 0.0)
        return y

    def kernel(*refs):
        x_ref = refs[0]
        out_ref = refs[-1]
        p = 1  # running pointer into param refs

        x = x_ref[...].astype(jnp.float32)

        # Input BatchNorm.
        x = bn(x, refs[p][...], relu=False)
        p += 1

        # Hidden layers: Linear (bias dropped -- cancels in BN) -> BN -> ReLU.
        for _ in range(num_hidden):
            w = refs[p][...]        # (d_in, d_out) bf16
            gb = refs[p + 1][...]   # (2, d_out)    f32
            p += 2
            z = jnp.dot(x.astype(jnp.bfloat16), w,
                        preferred_element_type=jnp.float32)
            x = bn(z, gb, relu=True)

        # Output layer: Linear -> tanh.
        w_out = refs[p][...]        # (d_in, action) bf16
        b_out = refs[p + 1][...]    # (1, action)    f32
        y = jnp.dot(x.astype(jnp.bfloat16), w_out,
                    preferred_element_type=jnp.float32) + b_out
        out_ref[...] = jnp.tanh(y).astype(out_ref.dtype)

    return kernel


# ----------------------------------------------------------------------------
# Wrapper
# ----------------------------------------------------------------------------
def actor_forward(state, packed_params, num_hidden):
    """packed_params layout (see pack_actor_params):
       [bn0_gb(2,S), (W bf16, gb(2,out)) * num_hidden, W_out bf16, b_out(1,A)]
    """
    batch = state.shape[0]
    action_size = packed_params[-1].shape[-1]

    inputs = [state] + list(packed_params)

    # Full-residency (no grid) is only valid while everything fits in VMEM
    # with headroom; v7x has 64 MiB physical / 32 MiB scoped by default.
    # TODO(synk): if batch ever grows past this guard, restructure into a
    # two-pass gridded kernel (pass 1: accumulate per-feature sum/sumsq over a
    # batch grid marked "arbitrary"; pass 2: normalize + matmul with the batch
    # axis marked "parallel" so v7x's two TensorCores split the work).
    vmem_bytes = sum(a.size * a.dtype.itemsize for a in inputs)
    vmem_bytes += batch * action_size * 4
    assert vmem_bytes < 24 * 1024 * 1024, "batch too large for full-VMEM residency"

    kernel = _make_actor_kernel(num_hidden, batch)

    return pl.pallas_call(
        kernel,
        out_shape=jax.ShapeDtypeStruct((batch, action_size), jnp.float32),
        # Whole problem fits in VMEM: no grid, full-array blocks.
        in_specs=[pl.BlockSpec(memory_space=pltpu.MemorySpace.VMEM)] * len(inputs),
        out_specs=pl.BlockSpec(memory_space=pltpu.MemorySpace.VMEM),
    )(*inputs)


# ----------------------------------------------------------------------------
# Parameters (module-faithful f32 init + packing for the kernel)
# ----------------------------------------------------------------------------
def init_actor_params(key, state_size, action_size, hidden_layers):
    """Module-faithful flat f32 param list:
       [bn0_g, bn0_b, (W, b, g, be) * num_hidden, W_out, b_out]
       - hidden / output weights: U(-1/sqrt(out_features), 1/sqrt(out_features))
       - biases: U(-1/sqrt(in_features), 1/sqrt(in_features)) (nn.Linear default)
       - batchnorm affine: gamma=1, beta=0
    """
    dims = [state_size] + list(hidden_layers)
    params = [jnp.ones((1, state_size), jnp.float32),
              jnp.zeros((1, state_size), jnp.float32)]

    for d_in, d_out in zip(dims[:-1], dims[1:]):
        key, kw, kb = jax.random.split(key, 3)
        lim_w = 1.0 / jnp.sqrt(jnp.float32(d_out))
        lim_b = 1.0 / jnp.sqrt(jnp.float32(d_in))
        w = jax.random.uniform(kw, (d_in, d_out), jnp.float32, -lim_w, lim_w)
        b = jax.random.uniform(kb, (1, d_out), jnp.float32, -lim_b, lim_b)
        params += [w, b,
                   jnp.ones((1, d_out), jnp.float32),
                   jnp.zeros((1, d_out), jnp.float32)]

    d_in = dims[-1]
    key, kw, kb = jax.random.split(key, 3)
    lim_w = 1.0 / jnp.sqrt(jnp.float32(action_size))
    lim_b = 1.0 / jnp.sqrt(jnp.float32(d_in))
    w_out = jax.random.uniform(kw, (d_in, action_size), jnp.float32, -lim_w, lim_w)
    b_out = jax.random.uniform(kb, (1, action_size), jnp.float32, -lim_b, lim_b)
    params += [w_out, b_out]
    return params


def pack_actor_params(params, num_hidden):
    """One-time repack into the kernel input layout (done at weight-load time,
    not per call): stack (gamma, beta) -> (2, F), cast weights to bf16, and
    drop hidden-layer Linear biases (they cancel exactly inside training-mode
    BatchNorm's mean subtraction — keep them in `params` if round-tripping to
    the PyTorch module)."""
    p = 0
    packed = [jnp.concatenate([params[p], params[p + 1]], axis=0)]  # (2, S)
    p += 2
    for _ in range(num_hidden):
        w, _b, g, be = params[p:p + 4]
        p += 4
        packed.append(w.astype(jnp.bfloat16))
        packed.append(jnp.concatenate([g, be], axis=0))             # (2, d_out)
    w_out, b_out = params[p], params[p + 1]
    packed.append(w_out.astype(jnp.bfloat16))
    packed.append(b_out)
    return packed


# ----------------------------------------------------------------------------
# Pure-JAX references
# ----------------------------------------------------------------------------
def _batchnorm_train(x, gamma, beta):
    mean = jnp.mean(x, axis=0, keepdims=True)
    var = jnp.mean((x - mean) ** 2, axis=0, keepdims=True)
    return (x - mean) * jax.lax.rsqrt(var + EPS) * gamma + beta


def actor_forward_ref(state, params, num_hidden, matmul_dtype=jnp.float32):
    """Module math (bias included, classic two-pass BN).  `matmul_dtype=bf16`
    mirrors the kernel's bf16 weight storage / dot-boundary cast."""
    p = 0
    x = state.astype(jnp.float32)
    x = _batchnorm_train(x, params[p], params[p + 1]); p += 2
    for _ in range(num_hidden):
        w, b, g, be = params[p:p + 4]; p += 4
        z = jnp.dot(x.astype(matmul_dtype), w.astype(matmul_dtype),
                    preferred_element_type=jnp.float32) + b
        x = jnp.maximum(_batchnorm_train(z, g, be), 0.0)
    w_out, b_out = params[p], params[p + 1]
    y = jnp.dot(x.astype(matmul_dtype), w_out.astype(matmul_dtype),
                preferred_element_type=jnp.float32) + b_out
    return jnp.tanh(y)


# ----------------------------------------------------------------------------
if __name__ == "__main__":
    state_size = 16
    action_size = 4
    hidden_layers = [64, 64]
    batch = 8

    key = jax.random.PRNGKey(0)
    key, k_state, k_params = jax.random.split(key, 3)

    state = jax.random.normal(k_state, (batch, state_size), jnp.float32)
    params = init_actor_params(k_params, state_size, action_size, hidden_layers)
    packed = pack_actor_params(params, len(hidden_layers))

    fwd = jax.jit(functools.partial(actor_forward, num_hidden=len(hidden_layers)))
    out = fwd(state, packed)
    jax.block_until_ready(out)

    # Tight check: same math with bf16 weights / bf16 dot boundary.
    ref_bf16 = actor_forward_ref(state, params, len(hidden_layers), jnp.bfloat16)
    # Loose sanity check: bf16-at-dot drift vs the pure-f32 module forward is bounded.
    ref_f32 = actor_forward_ref(state, params, len(hidden_layers), jnp.float32)

    assert out.shape == (batch, action_size)
    assert jnp.allclose(out, ref_bf16, atol=1e-4, rtol=1e-4), \
        "mismatch vs bf16-boundary JAX reference"
    assert jnp.allclose(out, ref_f32, atol=2e-2, rtol=2e-2), \
        "bf16 dot-boundary drift too large vs f32 module reference"

    print("KERNEL_OK")
</pallas_src>

<mosaic_0001>
module attributes {stable_mosaic.version = 11 : i64} {
  func.func @kernel(%arg0: memref<8x16xf32, #tpu.memory_space<vmem>>, %arg1: memref<2x16xf32, #tpu.memory_space<vmem>>, %arg2: memref<16x64xbf16, #tpu.memory_space<vmem>>, %arg3: memref<2x64xf32, #tpu.memory_space<vmem>>, %arg4: memref<64x64xbf16, #tpu.memory_space<vmem>>, %arg5: memref<2x64xf32, #tpu.memory_space<vmem>>, %arg6: memref<64x4xbf16, #tpu.memory_space<vmem>>, %arg7: memref<1x4xf32, #tpu.memory_space<vmem>>, %arg8: memref<8x4xf32, #tpu.memory_space<vmem>>) attributes {dimension_semantics = [], scalar_prefetch = 0 : i64, scratch_operands = 0 : i64, tpu.core_type = #tpu.core_type<tc>} {
    %c0 = arith.constant 0 : index
    %c0_0 = arith.constant 0 : index
    %0 = vector.load %arg0[%c0, %c0_0] : memref<8x16xf32, #tpu.memory_space<vmem>>, vector<8x16xf32>
    %c0_1 = arith.constant 0 : index
    %c0_2 = arith.constant 0 : index
    %1 = vector.load %arg1[%c0_1, %c0_2] : memref<2x16xf32, #tpu.memory_space<vmem>>, vector<2x16xf32>
    %cst = arith.constant dense<0.000000e+00> : vector<16xf32>
    %2 = vector.multi_reduction <add>, %0, %cst [0] : vector<8x16xf32> to vector<16xf32>
    %3 = vector.shape_cast %2 : vector<16xf32> to vector<1x16xf32>
    %cst_3 = arith.constant 1.250000e-01 : f32
    %4 = vector.broadcast %cst_3 : f32 to vector<1x16xf32>
    %5 = arith.mulf %3, %4 : vector<1x16xf32>
    %6 = arith.mulf %0, %0 : vector<8x16xf32>
    %cst_4 = arith.constant dense<0.000000e+00> : vector<16xf32>
    %7 = vector.multi_reduction <add>, %6, %cst_4 [0] : vector<8x16xf32> to vector<16xf32>
    %8 = vector.shape_cast %7 : vector<16xf32> to vector<1x16xf32>
    %cst_5 = arith.constant 1.250000e-01 : f32
    %9 = vector.broadcast %cst_5 : f32 to vector<1x16xf32>
    %10 = arith.mulf %8, %9 : vector<1x16xf32>
    %11 = arith.mulf %5, %5 : vector<1x16xf32>
    %12 = arith.subf %10, %11 : vector<1x16xf32>
    %cst_6 = arith.constant 0.000000e+00 : f32
    %13 = vector.broadcast %cst_6 : f32 to vector<1x16xf32>
    %14 = arith.maximumf %12, %13 : vector<1x16xf32>
    %15 = vector.extract_strided_slice %1 {offsets = [0, 0], sizes = [1, 16], strides = [1, 1]} : vector<2x16xf32> to vector<1x16xf32>
    %cst_7 = arith.constant 9.99999974E-6 : f32
    %16 = vector.broadcast %cst_7 : f32 to vector<1x16xf32>
    %17 = arith.addf %14, %16 : vector<1x16xf32>
    %18 = math.rsqrt %17 : vector<1x16xf32>
    %19 = arith.mulf %15, %18 : vector<1x16xf32>
    %20 = vector.extract_strided_slice %1 {offsets = [1, 0], sizes = [1, 16], strides = [1, 1]} : vector<2x16xf32> to vector<1x16xf32>
    %21 = arith.mulf %5, %19 : vector<1x16xf32>
    %22 = arith.subf %20, %21 : vector<1x16xf32>
    %23 = vector.broadcast %19 : vector<1x16xf32> to vector<8x16xf32>
    %24 = arith.mulf %0, %23 : vector<8x16xf32>
    %25 = vector.broadcast %22 : vector<1x16xf32> to vector<8x16xf32>
    %26 = arith.addf %24, %25 : vector<8x16xf32>
    %c0_8 = arith.constant 0 : index
    %c0_9 = arith.constant 0 : index
    %27 = vector.load %arg2[%c0_8, %c0_9] : memref<16x64xbf16, #tpu.memory_space<vmem>>, vector<16x64xbf16>
    %c0_10 = arith.constant 0 : index
    %c0_11 = arith.constant 0 : index
    %28 = vector.load %arg3[%c0_10, %c0_11] : memref<2x64xf32, #tpu.memory_space<vmem>>, vector<2x64xf32>
    %29 = arith.truncf %26 : vector<8x16xf32> to vector<8x16xbf16>
    %cst_12 = arith.constant dense<0.000000e+00> : vector<8x64xf32>
    %30 = tpu.matmul %29, %27, %cst_12 {dimension_numbers = #tpu.dot_dimension_numbers<[1], [0], [0], [1], [0, 0, 1, 1], [], []>} : vector<8x16xbf16>, vector<16x64xbf16>, vector<8x64xf32> -> vector<8x64xf32>
    %cst_13 = arith.constant dense<0.000000e+00> : vector<64xf32>
    %31 = vector.multi_reduction <add>, %30, %cst_13 [0] : vector<8x64xf32> to vector<64xf32>
    %32 = vector.shape_cast %31 : vector<64xf32> to vector<1x64xf32>
    %cst_14 = arith.constant 1.250000e-01 : f32
    %33 = vector.broadcast %cst_14 : f32 to vector<1x64xf32>
    %34 = arith.mulf %32, %33 : vector<1x64xf32>
    %35 = arith.mulf %30, %30 : vector<8x64xf32>
    %cst_15 = arith.constant dense<0.000000e+00> : vector<64xf32>
    %36 = vector.multi_reduction <add>, %35, %cst_15 [0] : vector<8x64xf32> to vector<64xf32>
    %37 = vector.shape_cast %36 : vector<64xf32> to vector<1x64xf32>
    %cst_16 = arith.constant 1.250000e-01 : f32
    %38 = vector.broadcast %cst_16 : f32 to vector<1x64xf32>
    %39 = arith.mulf %37, %38 : vector<1x64xf32>
    %40 = arith.mulf %34, %34 : vector<1x64xf32>
    %41 = arith.subf %39, %40 : vector<1x64xf32>
    %cst_17 = arith.constant 0.000000e+00 : f32
    %42 = vector.broadcast %cst_17 : f32 to vector<1x64xf32>
    %43 = arith.maximumf %41, %42 : vector<1x64xf32>
    %44 = vector.extract_strided_slice %28 {offsets = [0, 0], sizes = [1, 64], strides = [1, 1]} : vector<2x64xf32> to vector<1x64xf32>
    %cst_18 = arith.constant 9.99999974E-6 : f32
    %45 = vector.broadcast %cst_18 : f32 to vector<1x64xf32>
    %46 = arith.addf %43, %45 : vector<1x64xf32>
    %47 = math.rsqrt %46 : vector<1x64xf32>
    %48 = arith.mulf %44, %47 : vector<1x64xf32>
    %49 = vector.extract_strided_slice %28 {offsets = [1, 0], sizes = [1, 64], strides = [1, 1]} : vector<2x64xf32> to vector<1x64xf32>
    %50 = arith.mulf %34, %48 : vector<1x64xf32>
    %51 = arith.subf %49, %50 : vector<1x64xf32>
    %52 = vector.broadcast %48 : vector<1x64xf32> to vector<8x64xf32>
    %53 = arith.mulf %30, %52 : vector<8x64xf32>
    %54 = vector.broadcast %51 : vector<1x64xf32> to vector<8x64xf32>
    %55 = arith.addf %53, %54 : vector<8x64xf32>
    %cst_19 = arith.constant 0.000000e+00 : f32
    %56 = vector.broadcast %cst_19 : f32 to vector<8x64xf32>
    %57 = arith.maximumf %55, %56 : vector<8x64xf32>
    %c0_20 = arith.constant 0 : index
    %c0_21 = arith.constant 0 : index
    %58 = vector.load %arg4[%c0_20, %c0_21] : memref<64x64xbf16, #tpu.memory_space<vmem>>, vector<64x64xbf16>
    %c0_22 = arith.constant 0 : index
    %c0_23 = arith.constant 0 : index
    %59 = vector.load %arg5[%c0_22, %c0_23] : memref<2x64xf32, #tpu.memory_space<vmem>>, vector<2x64xf32>
    %60 = arith.truncf %57 : vector<8x64xf32> to vector<8x64xbf16>
    %cst_24 = arith.constant dense<0.000000e+00> : vector<8x64xf32>
    %61 = tpu.matmul %60, %58, %cst_24 {dimension_numbers = #tpu.dot_dimension_numbers<[1], [0], [0], [1], [0, 0, 1, 1], [], []>} : vector<8x64xbf16>, vector<64x64xbf16>, vector<8x64xf32> -> vector<8x64xf32>
    %cst_25 = arith.constant dense<0.000000e+00> : vector<64xf32>
    %62 = vector.multi_reduction <add>, %61, %cst_25 [0] : vector<8x64xf32> to vector<64xf32>
    %63 = vector.shape_cast %62 : vector<64xf32> to vector<1x64xf32>
    %cst_26 = arith.constant 1.250000e-01 : f32
    %64 = vector.broadcast %cst_26 : f32 to vector<1x64xf32>
    %65 = arith.mulf %63, %64 : vector<1x64xf32>
    %66 = arith.mulf %61, %61 : vector<8x64xf32>
    %cst_27 = arith.constant dense<0.000000e+00> : vector<64xf32>
    %67 = vector.multi_reduction <add>, %66, %cst_27 [0] : vector<8x64xf32> to vector<64xf32>
    %68 = vector.shape_cast %67 : vector<64xf32> to vector<1x64xf32>
    %cst_28 = arith.constant 1.250000e-01 : f32
    %69 = vector.broadcast %cst_28 : f32 to vector<1x64xf32>
    %70 = arith.mulf %68, %69 : vector<1x64xf32>
    %71 = arith.mulf %65, %65 : vector<1x64xf32>
    %72 = arith.subf %70, %71 : vector<1x64xf32>
    %cst_29 = arith.constant 0.000000e+00 : f32
    %73 = vector.broadcast %cst_29 : f32 to vector<1x64xf32>
    %74 = arith.maximumf %72, %73 : vector<1x64xf32>
    %75 = vector.extract_strided_slice %59 {offsets = [0, 0], sizes = [1, 64], strides = [1, 1]} : vector<2x64xf32> to vector<1x64xf32>
    %cst_30 = arith.constant 9.99999974E-6 : f32
    %76 = vector.broadcast %cst_30 : f32 to vector<1x64xf32>
    %77 = arith.addf %74, %76 : vector<1x64xf32>
    %78 = math.rsqrt %77 : vector<1x64xf32>
    %79 = arith.mulf %75, %78 : vector<1x64xf32>
    %80 = vector.extract_strided_slice %59 {offsets = [1, 0], sizes = [1, 64], strides = [1, 1]} : vector<2x64xf32> to vector<1x64xf32>
    %81 = arith.mulf %65, %79 : vector<1x64xf32>
    %82 = arith.subf %80, %81 : vector<1x64xf32>
    %83 = vector.broadcast %79 : vector<1x64xf32> to vector<8x64xf32>
    %84 = arith.mulf %61, %83 : vector<8x64xf32>
    %85 = vector.broadcast %82 : vector<1x64xf32> to vector<8x64xf32>
    %86 = arith.addf %84, %85 : vector<8x64xf32>
    %cst_31 = arith.constant 0.000000e+00 : f32
    %87 = vector.broadcast %cst_31 : f32 to vector<8x64xf32>
    %88 = arith.maximumf %86, %87 : vector<8x64xf32>
    %c0_32 = arith.constant 0 : index
    %c0_33 = arith.constant 0 : index
    %89 = vector.load %arg6[%c0_32, %c0_33] : memref<64x4xbf16, #tpu.memory_space<vmem>>, vector<64x4xbf16>
    %c0_34 = arith.constant 0 : index
    %c0_35 = arith.constant 0 : index
    %90 = vector.load %arg7[%c0_34, %c0_35] : memref<1x4xf32, #tpu.memory_space<vmem>>, vector<1x4xf32>
    %91 = arith.truncf %88 : vector<8x64xf32> to vector<8x64xbf16>
    %cst_36 = arith.constant dense<0.000000e+00> : vector<8x4xf32>
    %92 = tpu.matmul %91, %89, %cst_36 {dimension_numbers = #tpu.dot_dimension_numbers<[1], [0], [0], [1], [0, 0, 1, 1], [], []>} : vector<8x64xbf16>, vector<64x4xbf16>, vector<8x4xf32> -> vector<8x4xf32>
    %93 = vector.broadcast %90 : vector<1x4xf32> to vector<8x4xf32>
    %94 = arith.addf %92, %93 : vector<8x4xf32>
    %95 = math.tanh %94 : vector<8x4xf32>
    %c0_37 = arith.constant 0 : index
    %c0_38 = arith.constant 0 : index
    %96 = vector.load %arg8[%c0_37, %c0_38] : memref<8x4xf32, #tpu.memory_space<vmem>>, vector<8x4xf32>
    tpu.vector_store %arg8[%c0_37, %c0_38], %95 {strides = array<i32>} : memref<8x4xf32, #tpu.memory_space<vmem>>, vector<8x4xf32>,
    return
  }
}

</mosaic_0001>

<bundles_post_ra>
// kernel: actor_forward.1
= control target key start
LH: loop header
LB: loop body
LE: loop exit
PB: predicated region body
PF: predicated region fallthrough
CT: control target
= control target key end

     0   :  { %13 = vsyncpa [#allocation3], 0  ;;  %s666_s0 = inlined_call_operand.vmem [shape: f32[8,16], index: 0, kind: input, shape index: {}]   ;;  %s667_s1 = inlined_call_operand.hbm [shape: f32[2,16], index: 1, kind: input, shape index: {}]   ;;  %s668_s2 = inlined_call_operand.vmem [shape: bf16[16,64], index: 2, kind: input, shape index: {}]   ;;  %s669_s3 = inlined_call_operand.hbm [shape: f32[2,64], index: 3, kind: input, shape index: {}]   ;;  %s670_s4 = inlined_call_operand.vmem [shape: bf16[64,64], index: 4, kind: input, shape index: {}]   ;;  %s671_s5 = inlined_call_operand.vmem [shape: f32[2,64], index: 5, kind: input, shape index: {}]   ;;  %s672_s6 = inlined_call_operand.vmem [shape: bf16[64,4], index: 6, kind: input, shape index: {}]   ;;  %s673_s7 = inlined_call_operand.vmem [shape: f32[1,4], index: 7, kind: input, shape index: {}]   ;;  %s674_s8 = inlined_call_operand.vmem [shape: f32[8,4], index: 8, kind: output, shape index: {}]  }
   0x1   :  { %14 = vsyncpa [#allocation5], 0  ;;  %s520_s27 = smov [#allocation2]   ;;  %s521_s29 = smov [#allocation4]  }
   0x2   :  { %s23_s28 = sshll.u32 %s520_s27, 4  ;;  %s35_s30 = sshll.u32 %s521_s29, 4  ;;  %s24_s28 = int_to_ptr.vmem [resolvable:$true] %s23_s28  ;;  %s36_s30 = int_to_ptr.vmem [resolvable:$true] %s35_s30 }
   0x3   :  { %s472_s11 = scalar_lea.hbm %s667_s1, 32 }
   0x4   :  { %p473_p0 = scmp.ne.s32.totalorder %s667_s1, %s472_s11  ;;  %p476_p1 = scmp.lt.u32.totalorder %s472_s11, %s667_s1 }
   0x6   :  { %p478_p2 = pnand %p476_p1, %p473_p0 }
   0x8   :  { %481 = shalt.err (!%p478_p2)
}
   0x9   :  { %s482_s16 = scalar_lea.vmem %s24_s28, 32  ;;  %p487_p4 = scmp.lt.s32.totalorder %s24_s28, %s24_s28 }
   0xa   :  { %p483_p3 = scmp.ne.s32.totalorder %s24_s28, %s482_s16  ;;  %p488_p5 = scmp.lt.s32.totalorder %s482_s16, %s482_s16 }
   0xc   :  { %p489_p6 = por %p488_p5, %p487_p4 }
   0xe   :  { %p490_p7 = pnand %p489_p6, %p483_p3 }
  0x10   :  { %493 = shalt.err (!%p490_p7)
}
  0x11   :  { %26 = dma.hbm_to_vmem [thread:$0]  %s667_s1, 32, %s24_s28, [#allocation3]  }
  0x12   :  { %s494_s21 = scalar_lea.hbm %s669_s3, 32 }
  0x13   :  { %p495_p8 = scmp.ne.s32.totalorder %s669_s3, %s494_s21  ;;  %p498_p9 = scmp.lt.u32.totalorder %s494_s21, %s669_s3 }
  0x15   :  { %p500_p10 = pnand %p498_p9, %p495_p8 }
  0x17   :  { %503 = shalt.err (!%p500_p10)
}
  0x18   :  { %s504_s26 = scalar_lea.vmem %s36_s30, 32  ;;  %p509_p12 = scmp.lt.s32.totalorder %s36_s30, %s36_s30 }
  0x19   :  { %p505_p11 = scmp.ne.s32.totalorder %s36_s30, %s504_s26  ;;  %p510_p13 = scmp.lt.s32.totalorder %s504_s26, %s504_s26 }
  0x1b   :  { %p511_p0 = por %p510_p13, %p509_p12 }
  0x1d   :  { %p512_p1 = pnand %p511_p0, %p505_p11 }
  0x1f   :  { %515 = shalt.err (!%p512_p1)
}
  0x20   :  { %38 = dma.hbm_to_vmem [thread:$0]  %s669_s3, 32, %s36_s30, [#allocation5]  }
  0x21   :  { %516 = dma.done.wait [#allocation3], 32  }
  0x22   :  { %517 = vsyncadd [#allocation3], 4294967264 }
  0x23   :  { %518 = dma.done.wait [#allocation5], 32  }
  0x24   :  { %519 = vsyncadd [#allocation5], 4294967264  ;;  %v522_v0 = vmov 0.0   ;;  %vm523_vm0 = vmmov 0   ;;  %vm56_vm1 = vcmask 130048   ;;  %v455_v1 = vld [vmem:[%s668_s2] sm:$0xff]   ;;  %v85_v24 = vlaneseq }
  0x25   :  { %421 = vmatprep.subr.bf16.mxu0 %v522_v0  ;;  %423 = vmatprep.mubr.msk.bf16.mxu0 %vm523_vm0, %v522_v0  ;;  %v54_v2 = vld [vmem:[%s666_s0] sm:$0xff]  ;;  %v457_v40 = vld [vmem:[%s670_s4 + $0x8] sm:$0xff]   ;;  %v458_v41 = vld [vmem:[%s670_s4 + $0x10] sm:$0xff]   ;;  %vm148_vm2 = vcmask 523264   ;;  %vm388_vm3 = vcmask 31744  }
  0x26   :  { %427 = vmatprep.subr.bf16.mxu1 %v522_v0  ;;  %435 = vmatprep.mubr.msk.bf16.mxu1 %vm523_vm0, %v522_v0  ;;  %v57_v3 = vsel %vm56_vm1, %v54_v2, 0.0  ;;  %v65_v4 = vmul.f32 %v54_v2, %v54_v2  ;;  %v86_v25 = vshrl.u32 %v85_v24, 7  ;;  %v55_v26 = vld [vmem:[#allocation2] sm:$0x3]  ;;  %v459_v42 = vld [vmem:[%s670_s4 + $0x18] sm:$0xff]  }
  0x27   :  { %422 = vmatpush3.bf16.msra.mxu0 %v455_v1  ;;  %v58_v5 = vrot.slane %v57_v3, 4  ;;  %v456_v39 = vld [vmem:[%s670_s4] sm:$0xff]  }
  0x28   :  { %439 = vmatprep.subr.bf16.mxu0 %v522_v0  ;;  %v66_v6 = vsel %vm56_vm1, %v65_v4, 0.0  ;;  %v608_v27 = vsub.s32 0, %v86_v25  ;;  %v611_v33 = vsub.s32 1, %v86_v25  ;;  %428 = vmatpush3.bf16.msra.mxu1 %v456_v39 }
  0x29   :  { %v59_v7 = vadd.f32 %v58_v5, %v57_v3  ;;  %v67_v8 = vrot.slane %v66_v6, 4  ;;  %429 = vmatprep.subr.bf16.mxu1 %v522_v0  ;;  %v97_v5 = vld [vmem:[#allocation4] sm:$0x3] }
  0x2b   :  { %v60_v9 = vrot.slane %v59_v7, 2  ;;  %v68_v10 = vadd.f32 %v67_v8, %v66_v6 }
  0x2c   :  { %430 = vmatpush3.bf16.msra.mxu1 %v457_v40 }
  0x2d   :  { %v61_v11 = vadd.f32 %v60_v9, %v59_v7  ;;  %v69_v12 = vrot.slane %v68_v10, 2  ;;  %431 = vmatprep.subr.bf16.mxu1 %v522_v0 }
  0x2f   :  { %v62_v13 = vrot.slane %v61_v11, 1  ;;  %v70_v14 = vadd.f32 %v69_v12, %v68_v10 }
  0x30   :  { %432 = vmatpush3.bf16.msra.mxu1 %v458_v41 }
  0x31   :  { %v63_v15 = vadd.f32 %v62_v13, %v61_v11  ;;  %v71_v16 = vrot.slane %v70_v14, 1  ;;  %433 = vmatprep.subr.bf16.mxu1 %v522_v0 }
  0x33   :  { %v64_v17 = vmul.f32 0.125, %v63_v15  ;;  %v72_v18 = vadd.f32 %v71_v16, %v70_v14 }
  0x34   :  { %434 = vmatpush3.bf16.msra.mxu1 %v459_v42 }
  0x35   :  { %v73_v19 = vmul.f32 0.125, %v72_v18  ;;  %v74_v20 = vmul.f32 %v64_v17, %v64_v17  ;;  %v461_v18 = vld [vmem:[%s672_s6 + $0x8] sm:$0xff]  }
  0x37   :  { %v75_v21 = vsub.f32 %v73_v19, %v74_v20  ;;  %v462_v19 = vld [vmem:[%s672_s6 + $0x10] sm:$0xff]   ;;  %v463_v20 = vld [vmem:[%s672_s6 + $0x18] sm:$0xff]  }
  0x39   :  { %v76_v22 = vmax.f32 %v75_v21, 0.0 }
  0x3b   :  { %v77_v23 = vadd.f32 1e-05, %v76_v22 }
  0x3d   :  { %464 = vrsqrt.f32 %v77_v23 }
  0x47   :  { %v465_v28 = vpop.eup %464 }
  0x48   :  { %v79_v29 = vmul.f32 %v465_v28, %v55_v26 }
  0x4a   :  { %v80_v30 = vmul.f32 %v79_v29, %v64_v17  ;;  %v88_v31 = vrot.slane %v79_v29, %v608_v27  ;;  %v460_v17 = vld [vmem:[%s672_s6] sm:$0xff]  }
  0x4c   :  { %v82_v32 = vrot.slane %v80_v30, 7  ;;  %v89_v35 = vmul.f32 %v88_v31, %v54_v2 }
  0x4e   :  { %v84_v34 = vsub.f32 %v55_v26, %v82_v32 }
  0x50   :  { %v93_v36 = vrot.slane %v84_v34, %v611_v33 }
  0x52   :  { %v94_v37 = vadd.f32 %v93_v36, %v89_v35 }
  0x54   :  { %v98_v38 = vpack.c.bf16 %v94_v37, %v94_v37 }
  0x56   :  { %424 = vmatmul.mubr.msk.bf16.vlgmr.msra.gmra.mrb[0].mxu0 %vm56_vm1, %v98_v38 }
  0x57   :  { %447 = vmatprep.mubr.msk.bf16.mxu0 %vm523_vm0, %v522_v0  ;;  %440 = vmatpush3.bf16.msra.mxu0 %v460_v17 }
  0x58   :  { %441 = vmatprep.subr.bf16.mxu0 %v522_v0 }
  0x5b   :  { %442 = vmatpush3.bf16.msra.mxu0 %v461_v18 }
  0x5c   :  { %443 = vmatprep.subr.bf16.mxu0 %v522_v0 }
  0x5f   :  { %444 = vmatpush3.bf16.msra.mxu0 %v462_v19 }
  0x60   :  { %445 = vmatprep.subr.bf16.mxu0 %v522_v0 }
  0x63   :  { %446 = vmatpush3.bf16.msra.mxu0 %v463_v20 }
 0x129   :  { %v142_v43 = vpop.f32.mrb[0].mxu0 }
 0x12a   :  { %v149_v44 = vsel %vm148_vm2, %v142_v43, 0.0  ;;  %v157_v45 = vmul.f32 %v142_v43, %v142_v43  ;;  %v425_v46 = vpop.f32.mrb[1].mxu0 }
 0x12b   :  { %v150_v47 = vrot.slane %v149_v44, 4  ;;  %v145_v48 = vpop.f32.mrb[2].mxu0 }
 0x12c   :  { %v158_v49 = vsel %vm148_vm2, %v157_v45, 0.0  ;;  %v426_v50 = vpop.f32.mrb[3].mxu0 }
 0x12d   :  { %v151_v51 = vadd.f32 %v150_v47, %v149_v44  ;;  %v159_v52 = vrot.slane %v158_v49, 4  ;;  %v196_v47 = vld [vmem:[%s671_s5] sm:$0x3] }
 0x12f   :  { %v152_v53 = vrot.slane %v151_v51, 2  ;;  %v160_v54 = vadd.f32 %v159_v52, %v158_v49 }
 0x131   :  { %v153_v55 = vadd.f32 %v152_v53, %v151_v51  ;;  %v161_v56 = vrot.slane %v160_v54, 2 }
 0x133   :  { %v154_v57 = vrot.slane %v153_v55, 1  ;;  %v162_v58 = vadd.f32 %v161_v56, %v160_v54 }
 0x135   :  { %v155_v59 = vadd.f32 %v154_v57, %v153_v55  ;;  %v163_v60 = vrot.slane %v162_v58, 1 }
 0x137   :  { %v156_v61 = vmul.f32 0.125, %v155_v59  ;;  %v164_v62 = vadd.f32 %v163_v60, %v162_v58  ;;  %v403_v59 = vld [vmem:[%s673_s7] ss:$0 sm:$0xff] }
 0x139   :  { %v165_v63 = vmul.f32 0.125, %v164_v62  ;;  %v166_v1 = vmul.f32 %v156_v61, %v156_v61 }
 0x13b   :  { %v167_v2 = vsub.f32 %v165_v63, %v166_v1 }
 0x13d   :  { %v168_v3 = vmax.f32 %v167_v2, 0.0 }
 0x13f   :  { %v169_v4 = vadd.f32 1e-05, %v168_v3 }
 0x141   :  { %466 = vrsqrt.f32 %v169_v4 }
 0x14b   :  { %v467_v6 = vpop.eup %466 }
 0x14c   :  { %v171_v7 = vmul.f32 %v467_v6, %v97_v5 }
 0x14e   :  { %v172_v8 = vmul.f32 %v171_v7, %v156_v61  ;;  %v180_v10 = vrot.slane %v171_v7, %v608_v27 }
 0x150   :  { %v174_v9 = vrot.slane %v172_v8, 7  ;;  %v181_v12 = vmul.f32 %v180_v10, %v142_v43 }
 0x152   :  { %v176_v11 = vsub.f32 %v97_v5, %v174_v9 }
 0x154   :  { %v185_v13 = vrot.slane %v176_v11, %v611_v33 }
 0x156   :  { %v186_v14 = vadd.f32 %v185_v13, %v181_v12 }
 0x158   :  { %v187_v15 = vmax.f32 %v186_v14, 0.0 }
 0x15a   :  { %v197_v16 = vpack.c.bf16 %v187_v15, %v187_v15 }
 0x15c   :  { %436 = vmatmul.mubr.msk.bf16.vlgmr.msra.gmra.mrb[0].mxu1 %vm148_vm2, %v197_v16 }
 0x22f   :  { %v259_v21 = vpop.f32.mrb[0].mxu1 }
 0x230   :  { %v265_v22 = vsel %vm148_vm2, %v259_v21, 0.0  ;;  %v273_v23 = vmul.f32 %v259_v21, %v259_v21  ;;  %v437_v24 = vpop.f32.mrb[1].mxu1 }
 0x231   :  { %v266_v25 = vrot.slane %v265_v22, 4  ;;  %v262_v26 = vpop.f32.mrb[2].mxu1 }
 0x232   :  { %v274_v28 = vsel %vm148_vm2, %v273_v23, 0.0  ;;  %v438_v29 = vpop.f32.mrb[3].mxu1 }
 0x233   :  { %v267_v30 = vadd.f32 %v266_v25, %v265_v22  ;;  %v275_v31 = vrot.slane %v274_v28, 4 }
 0x235   :  { %v268_v32 = vrot.slane %v267_v30, 2  ;;  %v276_v34 = vadd.f32 %v275_v31, %v274_v28 }
 0x237   :  { %v269_v0 = vadd.f32 %v268_v32, %v267_v30  ;;  %v277_v35 = vrot.slane %v276_v34, 2 }
 0x239   :  { %v270_v36 = vrot.slane %v269_v0, 1  ;;  %v278_v37 = vadd.f32 %v277_v35, %v276_v34 }
 0x23b   :  { %v271_v38 = vadd.f32 %v270_v36, %v269_v0  ;;  %v279_v39 = vrot.slane %v278_v37, 1 }
 0x23d   :  { %v272_v40 = vmul.f32 0.125, %v271_v38  ;;  %v280_v41 = vadd.f32 %v279_v39, %v278_v37 }
 0x23f   :  { %v281_v42 = vmul.f32 0.125, %v280_v41  ;;  %v282_v43 = vmul.f32 %v272_v40, %v272_v40 }
 0x241   :  { %v283_v44 = vsub.f32 %v281_v42, %v282_v43 }
 0x243   :  { %v284_v45 = vmax.f32 %v283_v44, 0.0 }
 0x245   :  { %v285_v46 = vadd.f32 1e-05, %v284_v45 }
 0x247   :  { %468 = vrsqrt.f32 %v285_v46 }
 0x251   :  { %v469_v48 = vpop.eup %468 }
 0x252   :  { %v287_v49 = vmul.f32 %v469_v48, %v196_v47 }
 0x254   :  { %v288_v50 = vmul.f32 %v287_v49, %v272_v40  ;;  %v296_v52 = vrot.slane %v287_v49, %v608_v27 }
 0x256   :  { %v290_v51 = vrot.slane %v288_v50, 7  ;;  %v297_v54 = vmul.f32 %v296_v52, %v259_v21 }
 0x258   :  { %v292_v53 = vsub.f32 %v196_v47, %v290_v51 }
 0x25a   :  { %v301_v55 = vrot.slane %v292_v53, %v611_v33 }
 0x25c   :  { %v302_v56 = vadd.f32 %v301_v55, %v297_v54 }
 0x25e   :  { %v303_v57 = vmax.f32 %v302_v56, 0.0 }
 0x260   :  { %v313_v58 = vpack.c.bf16 %v303_v57, %v303_v57 }
 0x262   :  { %448 = vmatmul.mubr.msk.bf16.vlgmr.msra.gmra.mrb[4].mxu0 %vm148_vm2, %v313_v58 }
 0x335   :  { %v381_v60 = vpop.f32.mrb[4].mxu0 }
 0x336   :  { %v382_v61 = vadd.f32 %v403_v59, %v381_v60  ;;  %v449_v62 = vpop.f32.mrb[5].mxu0 }
 0x337   :  { %v384_v63 = vpop.f32.mrb[6].mxu0 }
 0x338   :  { %470 = vtanh.f32 %v382_v61  ;;  %v450_v1 = vpop.f32.mrb[7].mxu0 }
 0x342   :  { %v471_v27 = vpop.eup %470 }
 0x343   :  { %389 = vst.msk [vmem:[%s674_s8] sm:$0xff] %vm388_vm3, %v471_v27 }
 0x344   :  { %394 = vsyncpa [#allocation3], 1 }
 0x345   :  { %395 = vsyncpa [#allocation5], 1 }

</bundles_post_ra>
